<compile_context>
chip_gen: v7x
topology: tpu7x:2x2x1
jax: 0.10.0
libtpu: 0.0.40
codegen_flags: <defaults>
</compile_context>

<pallas_src>
import functools

import jax
import jax.numpy as jnp
from jax.experimental import pallas as pl
from jax.experimental.pallas import tpu as pltpu


def _hardswish(h):
    # PyTorch Hardswish: x * relu6(x + 3) / 6
    return h * jnp.clip(h + 3.0, 0.0, 6.0) * (1.0 / 6.0)


def resnet1d_block_kernel(x_ref, s1_ref, b1_ref, w1_ref, s2_ref, b2_ref,
                          w2_ref, out_ref, pad1_ref, pad2_ref, pool_ref, *,
                          seq_len, kernel_size, padding, dilation):
    M, _ = x_ref.shape            # M = Bt * L   (whole batch elements per tile)
    L = seq_len
    Mh = M // 2

    x = x_ref[...]                                      # (M, C_in) f32

    def conv_matmul(h, pad_ref, w_ref):
        """One K-tap conv as a single bf16 MXU matmul (im2col along lanes)."""
        m, c = h.shape
        # Batch-local time index of every row (block rows are whole batches).
        l_idx = jax.lax.broadcasted_iota(jnp.int32, (m, c), 0) % L
        # Stage h once; shifted views are plain sublane-offset reads.  Halo
        # rows of the scratch are never zeroed: every row they feed is masked.
        pad_ref[pl.ds(padding, m), :] = h
        cols = []
        for k in range(kernel_size):
            s = k * dilation - padding                  # tap offset in [-p, +p]
            if s == 0:
                cols.append(h)
                continue
            view = pad_ref[pl.ds(k * dilation, m), :]   # = h[i + s] (wrapped)
            valid = jnp.logical_and(l_idx + s >= 0, l_idx + s < L)
            cols.append(jnp.where(valid, view, 0.0))    # zero-padding + no
                                                        # cross-batch bleed
        lhs = jnp.concatenate(cols, axis=1).astype(jnp.bfloat16)   # (m, K*c)
        return jnp.dot(lhs, w_ref[...], preferred_element_type=jnp.float32)

    # ---- bn1 (folded, running stats) + Hardswish; Dropout(p=0) == identity --
    h1 = _hardswish(x * s1_ref[...] + b1_ref[...])
    a1 = conv_matmul(h1, pad1_ref, w1_ref)              # (M, C_out) f32

    # ---- bn2 (folded) + Hardswish; Dropout == identity ----------------------
    h2 = _hardswish(a1 * s2_ref[...] + b2_ref[...])
    a2 = conv_matmul(h2, pad2_ref, w2_ref)              # (M, C_out) f32

    # ---- MaxPool1d(2,2): even/odd strided sublane reads + VPU max -----------
    pool_ref[...] = a2
    pooled = jnp.maximum(pool_ref[pl.ds(0, Mh, stride=2), :],
                         pool_ref[pl.ds(1, Mh, stride=2), :])

    # ---- downsampling branch = MaxPool1d(2,2) on the raw input --------------
    ident = jnp.maximum(x_ref[pl.ds(0, Mh, stride=2), :],
                        x_ref[pl.ds(1, Mh, stride=2), :])

    out_ref[...] = pooled + ident


def resnet1d_block_forward(x_ncl, params, *, kernel_size=3, padding=1,
                           dilation=1, batch_block=None):
    """x_ncl: (B, C, L) float32 (PyTorch NCL). Returns (B, C, L//2)."""
    B, C, L = x_ncl.shape
    assert L % 2 == 0, "MaxPool1d(2,2) needs even L"
    assert 2 * padding == dilation * (kernel_size - 1), "conv must preserve L"
    c_out, c_in, K = params["w1"].shape
    assert c_in == C and K == kernel_size
    # `downsampling` is MaxPool1d(2,2) on the raw input -> residual add needs
    # matching channel counts.
    assert c_out == C, "identity (maxpool) downsample requires C_in == C_out"
    Lh = L // 2
    eps = 1e-5

    # Batch elements per grid step (amortizes per-step overhead / grows MXU M).
    if batch_block is None:
        max_rows = 4096                       # rows of the (rows, C) f32 tile
        bt = max(1, min(B, max_rows // L))
        while B % bt != 0:
            bt -= 1
    else:
        bt = batch_block
    assert B % bt == 0
    assert bt == B or (bt * L) % 16 == 0      # (8,128) rule incl. pooled output

    # NOTE: for production, accept NLC activations at the API boundary (or
    # transpose in-kernel) to avoid these two standalone XLA transpose passes.
    x2d = jnp.transpose(x_ncl, (0, 2, 1)).astype(jnp.float32).reshape(B * L, C)

    s1v = params["gamma1"] / jnp.sqrt(params["var1"] + eps)
    b1v = params["beta1"] - params["mean1"] * s1v
    s2v = params["gamma2"] / jnp.sqrt(params["var2"] + eps)
    b2v = params["beta2"] - params["mean2"] * s2v
    s1, b1, s2, b2 = (v[None, :].astype(jnp.float32)
                      for v in (s1v, b1v, s2v, b2v))              # (1, C)

    # PyTorch Conv1d weight (C_out, C_in, K) -> im2col weight (K*C_in, C_out),
    # bf16 for the MXU (f32 accumulation happens in the matmul).
    w1 = jnp.transpose(params["w1"], (2, 1, 0)).reshape(K * C, c_out)
    w2 = jnp.transpose(params["w2"], (2, 1, 0)).reshape(K * c_out, c_out)
    w1 = w1.astype(jnp.bfloat16)
    w2 = w2.astype(jnp.bfloat16)

    M = bt * L
    kern = functools.partial(resnet1d_block_kernel, seq_len=L,
                             kernel_size=kernel_size, padding=padding,
                             dilation=dilation)

    out2d = pl.pallas_call(
        kern,
        out_shape=jax.ShapeDtypeStruct((B * Lh, C), jnp.float32),
        grid_spec=pltpu.PrefetchScalarGridSpec(
            num_scalar_prefetch=0,
            grid=(B // bt,),
            in_specs=[
                pl.BlockSpec((M, C), lambda i: (i, 0)),              # x
                pl.BlockSpec((1, C), lambda i: (0, 0)),              # s1
                pl.BlockSpec((1, C), lambda i: (0, 0)),              # b1
                pl.BlockSpec((K * C, c_out), lambda i: (0, 0)),      # w1
                pl.BlockSpec((1, c_out), lambda i: (0, 0)),          # s2
                pl.BlockSpec((1, c_out), lambda i: (0, 0)),          # b2
                pl.BlockSpec((K * c_out, c_out), lambda i: (0, 0)),  # w2
            ],
            out_specs=pl.BlockSpec((bt * Lh, C), lambda i: (i, 0)),
            scratch_shapes=[
                pltpu.VMEM((M + 2 * padding, C), jnp.float32),      # conv1 stage
                pltpu.VMEM((M + 2 * padding, c_out), jnp.float32),  # conv2 stage
                pltpu.VMEM((M, c_out), jnp.float32),                # pool stage
            ],
        ),
        compiler_params=pltpu.CompilerParams(
            dimension_semantics=("parallel",),
            vmem_limit_bytes=32 * 1024 * 1024),
    )(x2d, s1, b1, w1, s2, b2, w2)

    return jnp.transpose(out2d.reshape(B, Lh, C), (0, 2, 1))        # (B, C, L/2)


def reference_forward(x, params, *, kernel_size=3, padding=1, dilation=1,
                      mxu_bf16=False):
    """Pure-JAX reference, PyTorch NCL layout, inference-mode BN.

    mxu_bf16=True rounds the conv operands to bf16 (f32 accumulation), which
    matches the kernel's MXU numerics.
    """
    eps = 1e-5

    def bn(h, g, b, m, v):
        return ((h - m[None, :, None]) / jnp.sqrt(v + eps)[None, :, None]
                * g[None, :, None] + b[None, :, None])

    def conv(h, w):
        if mxu_bf16:
            h = h.astype(jnp.bfloat16)
            w = w.astype(jnp.bfloat16)
            prec = None
        else:
            prec = jax.lax.Precision.HIGHEST
        return jax.lax.conv_general_dilated(
            h, w, window_strides=(1,), padding=[(padding, padding)],
            rhs_dilation=(dilation,), dimension_numbers=("NCH", "OIH", "NCH"),
            preferred_element_type=jnp.float32, precision=prec)

    def maxpool2(h):
        b, c, l = h.shape
        return h.reshape(b, c, l // 2, 2).max(axis=-1)

    out = _hardswish(bn(x, params["gamma1"], params["beta1"],
                        params["mean1"], params["var1"]))
    out = conv(out, params["w1"])
    out = _hardswish(bn(out, params["gamma2"], params["beta2"],
                        params["mean2"], params["var2"]))
    out = conv(out, params["w2"])
    out = maxpool2(out)
    return out + maxpool2(x)


if __name__ == "__main__":
    # TODO(synk): BatchNorm is implemented in inference mode (running stats);
    # training-mode batch statistics / Dropout masking are not reproduced.
    B, C, L, K = 2, 16, 32, 3          # in_channels == out_channels == 16
    key = jax.random.PRNGKey(0)
    ks = jax.random.split(key, 11)

    params = {
        "gamma1": jax.random.uniform(ks[0], (C,), jnp.float32, 0.5, 1.5),
        "beta1":  0.1 * jax.random.normal(ks[1], (C,), jnp.float32),
        "mean1":  0.1 * jax.random.normal(ks[2], (C,), jnp.float32),
        "var1":   jax.random.uniform(ks[3], (C,), jnp.float32, 0.5, 1.5),
        "w1":     jax.random.normal(ks[4], (C, C, K), jnp.float32) / (C * K) ** 0.5,
        "gamma2": jax.random.uniform(ks[5], (C,), jnp.float32, 0.5, 1.5),
        "beta2":  0.1 * jax.random.normal(ks[6], (C,), jnp.float32),
        "mean2":  0.1 * jax.random.normal(ks[7], (C,), jnp.float32),
        "var2":   jax.random.uniform(ks[8], (C,), jnp.float32, 0.5, 1.5),
        "w2":     jax.random.normal(ks[9], (C, C, K), jnp.float32) / (C * K) ** 0.5,
    }
    x = jax.random.normal(ks[10], (B, C, L), jnp.float32)

    out = jax.block_until_ready(resnet1d_block_forward(x, params))
    assert out.shape == (B, C, L // 2), out.shape

    # Tight check against a reference with matching MXU numerics (bf16 products,
    # f32 accumulation).
    ref_bf16 = jax.block_until_ready(reference_forward(x, params, mxu_bf16=True))
    assert jnp.allclose(out, ref_bf16, rtol=3e-3, atol=3e-3), (
        float(jnp.max(jnp.abs(out - ref_bf16))))

    # Looser sanity check against the full-f32 (HIGHEST precision) reference;
    # tolerance reflects bf16 MXU rounding.
    ref_f32 = jax.block_until_ready(reference_forward(x, params, mxu_bf16=False))
    assert jnp.allclose(out, ref_f32, rtol=5e-2, atol=5e-2), (
        float(jnp.max(jnp.abs(out - ref_f32))))

    print("KERNEL_OK")
</pallas_src>

<mosaic_0001>
module attributes {stable_mosaic.version = 11 : i64} {
  func.func @resnet1d_block_kernel(%arg0: i32, %arg1: memref<64x16xf32, #tpu.memory_space<vmem>>, %arg2: memref<1x16xf32, #tpu.memory_space<vmem>>, %arg3: memref<1x16xf32, #tpu.memory_space<vmem>>, %arg4: memref<48x16xbf16, #tpu.memory_space<vmem>>, %arg5: memref<1x16xf32, #tpu.memory_space<vmem>>, %arg6: memref<1x16xf32, #tpu.memory_space<vmem>>, %arg7: memref<48x16xbf16, #tpu.memory_space<vmem>>, %arg8: memref<32x16xf32, #tpu.memory_space<vmem>>, %arg9: memref<66x16xf32, #tpu.memory_space<vmem>>, %arg10: memref<66x16xf32, #tpu.memory_space<vmem>>, %arg11: memref<64x16xf32, #tpu.memory_space<vmem>>) attributes {dimension_semantics = [#tpu.dimension_semantics<parallel>], iteration_bounds = array<i64: 1>, scalar_prefetch = 0 : i64, scratch_operands = 3 : i64, tpu.core_type = #tpu.core_type<tc>, window_params = [{transform_indices = @transform_0, window_bounds = array<i64: 64, 16>}, {pipeline_mode = #tpu.pipeline_mode<synchronous>, transform_indices = @transform_1, window_bounds = array<i64: 1, 16>}, {pipeline_mode = #tpu.pipeline_mode<synchronous>, transform_indices = @transform_2, window_bounds = array<i64: 1, 16>}, {pipeline_mode = #tpu.pipeline_mode<synchronous>, transform_indices = @transform_3, window_bounds = array<i64: 48, 16>}, {pipeline_mode = #tpu.pipeline_mode<synchronous>, transform_indices = @transform_4, window_bounds = array<i64: 1, 16>}, {pipeline_mode = #tpu.pipeline_mode<synchronous>, transform_indices = @transform_5, window_bounds = array<i64: 1, 16>}, {pipeline_mode = #tpu.pipeline_mode<synchronous>, transform_indices = @transform_6, window_bounds = array<i64: 48, 16>}, {transform_indices = @transform_7, window_bounds = array<i64: 32, 16>}]} {
    %c0 = arith.constant 0 : index
    %c0_0 = arith.constant 0 : index
    %0 = vector.load %arg1[%c0, %c0_0] : memref<64x16xf32, #tpu.memory_space<vmem>>, vector<64x16xf32>
    %c0_1 = arith.constant 0 : index
    %c0_2 = arith.constant 0 : index
    %1 = vector.load %arg2[%c0_1, %c0_2] : memref<1x16xf32, #tpu.memory_space<vmem>>, vector<1x16xf32>
    %2 = vector.broadcast %1 : vector<1x16xf32> to vector<64x16xf32>
    %3 = arith.mulf %0, %2 : vector<64x16xf32>
    %c0_3 = arith.constant 0 : index
    %c0_4 = arith.constant 0 : index
    %4 = vector.load %arg3[%c0_3, %c0_4] : memref<1x16xf32, #tpu.memory_space<vmem>>, vector<1x16xf32>
    %5 = vector.broadcast %4 : vector<1x16xf32> to vector<64x16xf32>
    %6 = arith.addf %3, %5 : vector<64x16xf32>
    %cst = arith.constant 3.000000e+00 : f32
    %7 = vector.broadcast %cst : f32 to vector<64x16xf32>
    %8 = arith.addf %6, %7 : vector<64x16xf32>
    %cst_5 = arith.constant 0.000000e+00 : f32
    %cst_6 = arith.constant 6.000000e+00 : f32
    %9 = vector.broadcast %cst_5 : f32 to vector<64x16xf32>
    %10 = arith.maximumf %9, %8 : vector<64x16xf32>
    %11 = vector.broadcast %cst_6 : f32 to vector<64x16xf32>
    %12 = arith.minimumf %11, %10 : vector<64x16xf32>
    %13 = arith.mulf %6, %12 : vector<64x16xf32>
    %cst_7 = arith.constant 0.166666672 : f32
    %14 = vector.broadcast %cst_7 : f32 to vector<64x16xf32>
    %15 = arith.mulf %13, %14 : vector<64x16xf32>
    %16 = tpu.iota {dimensions = array<i32: 0>} : vector<64x16xi32>
    %c32_i32 = arith.constant 32 : i32
    %c0_i32 = arith.constant 0 : i32
    %17 = arith.cmpi eq, %c32_i32, %c0_i32 : i32
    %c1_i32 = arith.constant 1 : i32
    %18 = arith.select %17, %c1_i32, %c32_i32 : i32
    %19 = vector.broadcast %18 : i32 to vector<64x16xi32>
    %20 = arith.remsi %16, %19 : vector<64x16xi32>
    %c0_i32_8 = arith.constant 0 : i32
    %21 = vector.broadcast %c0_i32_8 : i32 to vector<64x16xi32>
    %22 = arith.cmpi ne, %20, %21 : vector<64x16xi32>
    %c0_i32_9 = arith.constant 0 : i32
    %23 = vector.broadcast %c0_i32_9 : i32 to vector<64x16xi32>
    %24 = arith.cmpi slt, %20, %23 : vector<64x16xi32>
    %c0_i32_10 = arith.constant 0 : i32
    %25 = arith.cmpi slt, %18, %c0_i32_10 : i32
    %26 = vector.broadcast %25 : i1 to vector<64x16xi1>
    %27 = vector.broadcast %26 : vector<64x16xi1> to vector<64x16xi1>
    %28 = arith.xori %24, %27 : vector<64x16xi1>
    %29 = arith.andi %28, %22 : vector<64x16xi1>
    %30 = vector.broadcast %18 : i32 to vector<64x16xi32>
    %31 = arith.addi %20, %30 : vector<64x16xi32>
    %32 = arith.select %29, %31, %20 : vector<64x16xi1>, vector<64x16xi32>
    %c1 = arith.constant 1 : index
    %c0_11 = arith.constant 0 : index
    %33 = vector.load %arg9[%c1, %c0_11] : memref<66x16xf32, #tpu.memory_space<vmem>>, vector<64x16xf32>
    tpu.vector_store %arg9[%c1, %c0_11], %15 {strides = array<i32>} : memref<66x16xf32, #tpu.memory_space<vmem>>, vector<64x16xf32>,
    %c0_12 = arith.constant 0 : index
    %c0_13 = arith.constant 0 : index
    %34 = vector.load %arg9[%c0_12, %c0_13] : memref<66x16xf32, #tpu.memory_space<vmem>>, vector<64x16xf32>
    %c-1_i32 = arith.constant -1 : i32
    %35 = vector.broadcast %c-1_i32 : i32 to vector<64x16xi32>
    %36 = arith.addi %32, %35 : vector<64x16xi32>
    %c0_i32_14 = arith.constant 0 : i32
    %37 = vector.broadcast %c0_i32_14 : i32 to vector<64x16xi32>
    %38 = arith.cmpi sge, %36, %37 : vector<64x16xi32>
    %c-1_i32_15 = arith.constant -1 : i32
    %39 = vector.broadcast %c-1_i32_15 : i32 to vector<64x16xi32>
    %40 = arith.addi %32, %39 : vector<64x16xi32>
    %c32_i32_16 = arith.constant 32 : i32
    %41 = vector.broadcast %c32_i32_16 : i32 to vector<64x16xi32>
    %42 = arith.cmpi slt, %40, %41 : vector<64x16xi32>
    %43 = arith.andi %38, %42 : vector<64x16xi1>
    %cst_17 = arith.constant 0.000000e+00 : f32
    %44 = vector.broadcast %cst_17 : f32 to vector<64x16xf32>
    %45 = arith.select %43, %34, %44 : vector<64x16xi1>, vector<64x16xf32>
    %c2 = arith.constant 2 : index
    %c0_18 = arith.constant 0 : index
    %46 = vector.load %arg9[%c2, %c0_18] : memref<66x16xf32, #tpu.memory_space<vmem>>, vector<64x16xf32>
    %c1_i32_19 = arith.constant 1 : i32
    %47 = vector.broadcast %c1_i32_19 : i32 to vector<64x16xi32>
    %48 = arith.addi %32, %47 : vector<64x16xi32>
    %c0_i32_20 = arith.constant 0 : i32
    %49 = vector.broadcast %c0_i32_20 : i32 to vector<64x16xi32>
    %50 = arith.cmpi sge, %48, %49 : vector<64x16xi32>
    %c1_i32_21 = arith.constant 1 : i32
    %51 = vector.broadcast %c1_i32_21 : i32 to vector<64x16xi32>
    %52 = arith.addi %32, %51 : vector<64x16xi32>
    %c32_i32_22 = arith.constant 32 : i32
    %53 = vector.broadcast %c32_i32_22 : i32 to vector<64x16xi32>
    %54 = arith.cmpi slt, %52, %53 : vector<64x16xi32>
    %55 = arith.andi %50, %54 : vector<64x16xi1>
    %cst_23 = arith.constant 0.000000e+00 : f32
    %56 = vector.broadcast %cst_23 : f32 to vector<64x16xf32>
    %57 = arith.select %55, %46, %56 : vector<64x16xi1>, vector<64x16xf32>
    %58 = tpu.concatenate %45, %15, %57 in 1 : vector<64x16xf32>, vector<64x16xf32>, vector<64x16xf32> -> vector<64x48xf32>
    %59 = arith.truncf %58 : vector<64x48xf32> to vector<64x48xbf16>
    %c0_24 = arith.constant 0 : index
    %c0_25 = arith.constant 0 : index
    %60 = vector.load %arg4[%c0_24, %c0_25] : memref<48x16xbf16, #tpu.memory_space<vmem>>, vector<48x16xbf16>
    %cst_26 = arith.constant dense<0.000000e+00> : vector<64x16xf32>
    %61 = tpu.matmul %59, %60, %cst_26 {dimension_numbers = #tpu.dot_dimension_numbers<[1], [0], [0], [1], [0, 0, 1, 1], [], []>} : vector<64x48xbf16>, vector<48x16xbf16>, vector<64x16xf32> -> vector<64x16xf32>
    %c0_27 = arith.constant 0 : index
    %c0_28 = arith.constant 0 : index
    %62 = vector.load %arg5[%c0_27, %c0_28] : memref<1x16xf32, #tpu.memory_space<vmem>>, vector<1x16xf32>
    %63 = vector.broadcast %62 : vector<1x16xf32> to vector<64x16xf32>
    %64 = arith.mulf %61, %63 : vector<64x16xf32>
    %c0_29 = arith.constant 0 : index
    %c0_30 = arith.constant 0 : index
    %65 = vector.load %arg6[%c0_29, %c0_30] : memref<1x16xf32, #tpu.memory_space<vmem>>, vector<1x16xf32>
    %66 = vector.broadcast %65 : vector<1x16xf32> to vector<64x16xf32>
    %67 = arith.addf %64, %66 : vector<64x16xf32>
    %cst_31 = arith.constant 3.000000e+00 : f32
    %68 = vector.broadcast %cst_31 : f32 to vector<64x16xf32>
    %69 = arith.addf %67, %68 : vector<64x16xf32>
    %cst_32 = arith.constant 0.000000e+00 : f32
    %cst_33 = arith.constant 6.000000e+00 : f32
    %70 = vector.broadcast %cst_32 : f32 to vector<64x16xf32>
    %71 = arith.maximumf %70, %69 : vector<64x16xf32>
    %72 = vector.broadcast %cst_33 : f32 to vector<64x16xf32>
    %73 = arith.minimumf %72, %71 : vector<64x16xf32>
    %74 = arith.mulf %67, %73 : vector<64x16xf32>
    %cst_34 = arith.constant 0.166666672 : f32
    %75 = vector.broadcast %cst_34 : f32 to vector<64x16xf32>
    %76 = arith.mulf %74, %75 : vector<64x16xf32>
    %77 = tpu.iota {dimensions = array<i32: 0>} : vector<64x16xi32>
    %c32_i32_35 = arith.constant 32 : i32
    %c0_i32_36 = arith.constant 0 : i32
    %78 = arith.cmpi eq, %c32_i32_35, %c0_i32_36 : i32
    %c1_i32_37 = arith.constant 1 : i32
    %79 = arith.select %78, %c1_i32_37, %c32_i32_35 : i32
    %80 = vector.broadcast %79 : i32 to vector<64x16xi32>
    %81 = arith.remsi %77, %80 : vector<64x16xi32>
    %c0_i32_38 = arith.constant 0 : i32
    %82 = vector.broadcast %c0_i32_38 : i32 to vector<64x16xi32>
    %83 = arith.cmpi ne, %81, %82 : vector<64x16xi32>
    %c0_i32_39 = arith.constant 0 : i32
    %84 = vector.broadcast %c0_i32_39 : i32 to vector<64x16xi32>
    %85 = arith.cmpi slt, %81, %84 : vector<64x16xi32>
    %c0_i32_40 = arith.constant 0 : i32
    %86 = arith.cmpi slt, %79, %c0_i32_40 : i32
    %87 = vector.broadcast %86 : i1 to vector<64x16xi1>
    %88 = vector.broadcast %87 : vector<64x16xi1> to vector<64x16xi1>
    %89 = arith.xori %85, %88 : vector<64x16xi1>
    %90 = arith.andi %89, %83 : vector<64x16xi1>
    %91 = vector.broadcast %79 : i32 to vector<64x16xi32>
    %92 = arith.addi %81, %91 : vector<64x16xi32>
    %93 = arith.select %90, %92, %81 : vector<64x16xi1>, vector<64x16xi32>
    %c1_41 = arith.constant 1 : index
    %c0_42 = arith.constant 0 : index
    %94 = vector.load %arg10[%c1_41, %c0_42] : memref<66x16xf32, #tpu.memory_space<vmem>>, vector<64x16xf32>
    tpu.vector_store %arg10[%c1_41, %c0_42], %76 {strides = array<i32>} : memref<66x16xf32, #tpu.memory_space<vmem>>, vector<64x16xf32>,
    %c0_43 = arith.constant 0 : index
    %c0_44 = arith.constant 0 : index
    %95 = vector.load %arg10[%c0_43, %c0_44] : memref<66x16xf32, #tpu.memory_space<vmem>>, vector<64x16xf32>
    %c-1_i32_45 = arith.constant -1 : i32
    %96 = vector.broadcast %c-1_i32_45 : i32 to vector<64x16xi32>
    %97 = arith.addi %93, %96 : vector<64x16xi32>
    %c0_i32_46 = arith.constant 0 : i32
    %98 = vector.broadcast %c0_i32_46 : i32 to vector<64x16xi32>
    %99 = arith.cmpi sge, %97, %98 : vector<64x16xi32>
    %c-1_i32_47 = arith.constant -1 : i32
    %100 = vector.broadcast %c-1_i32_47 : i32 to vector<64x16xi32>
    %101 = arith.addi %93, %100 : vector<64x16xi32>
    %c32_i32_48 = arith.constant 32 : i32
    %102 = vector.broadcast %c32_i32_48 : i32 to vector<64x16xi32>
    %103 = arith.cmpi slt, %101, %102 : vector<64x16xi32>
    %104 = arith.andi %99, %103 : vector<64x16xi1>
    %cst_49 = arith.constant 0.000000e+00 : f32
    %105 = vector.broadcast %cst_49 : f32 to vector<64x16xf32>
    %106 = arith.select %104, %95, %105 : vector<64x16xi1>, vector<64x16xf32>
    %c2_50 = arith.constant 2 : index
    %c0_51 = arith.constant 0 : index
    %107 = vector.load %arg10[%c2_50, %c0_51] : memref<66x16xf32, #tpu.memory_space<vmem>>, vector<64x16xf32>
    %c1_i32_52 = arith.constant 1 : i32
    %108 = vector.broadcast %c1_i32_52 : i32 to vector<64x16xi32>
    %109 = arith.addi %93, %108 : vector<64x16xi32>
    %c0_i32_53 = arith.constant 0 : i32
    %110 = vector.broadcast %c0_i32_53 : i32 to vector<64x16xi32>
    %111 = arith.cmpi sge, %109, %110 : vector<64x16xi32>
    %c1_i32_54 = arith.constant 1 : i32
    %112 = vector.broadcast %c1_i32_54 : i32 to vector<64x16xi32>
    %113 = arith.addi %93, %112 : vector<64x16xi32>
    %c32_i32_55 = arith.constant 32 : i32
    %114 = vector.broadcast %c32_i32_55 : i32 to vector<64x16xi32>
    %115 = arith.cmpi slt, %113, %114 : vector<64x16xi32>
    %116 = arith.andi %111, %115 : vector<64x16xi1>
    %cst_56 = arith.constant 0.000000e+00 : f32
    %117 = vector.broadcast %cst_56 : f32 to vector<64x16xf32>
    %118 = arith.select %116, %107, %117 : vector<64x16xi1>, vector<64x16xf32>
    %119 = tpu.concatenate %106, %76, %118 in 1 : vector<64x16xf32>, vector<64x16xf32>, vector<64x16xf32> -> vector<64x48xf32>
    %120 = arith.truncf %119 : vector<64x48xf32> to vector<64x48xbf16>
    %c0_57 = arith.constant 0 : index
    %c0_58 = arith.constant 0 : index
    %121 = vector.load %arg7[%c0_57, %c0_58] : memref<48x16xbf16, #tpu.memory_space<vmem>>, vector<48x16xbf16>
    %cst_59 = arith.constant dense<0.000000e+00> : vector<64x16xf32>
    %122 = tpu.matmul %120, %121, %cst_59 {dimension_numbers = #tpu.dot_dimension_numbers<[1], [0], [0], [1], [0, 0, 1, 1], [], []>} : vector<64x48xbf16>, vector<48x16xbf16>, vector<64x16xf32> -> vector<64x16xf32>
    %c0_60 = arith.constant 0 : index
    %c0_61 = arith.constant 0 : index
    %123 = vector.load %arg11[%c0_60, %c0_61] : memref<64x16xf32, #tpu.memory_space<vmem>>, vector<64x16xf32>
    tpu.vector_store %arg11[%c0_60, %c0_61], %122 {strides = array<i32>} : memref<64x16xf32, #tpu.memory_space<vmem>>, vector<64x16xf32>,
    %c0_62 = arith.constant 0 : index
    %c0_63 = arith.constant 0 : index
    %124 = tpu.strided_load %arg11[%c0_62, %c0_63] {strides = array<i32: 2, 1>} : memref<64x16xf32, #tpu.memory_space<vmem>>, vector<32x16xf32>
    %c1_64 = arith.constant 1 : index
    %c0_65 = arith.constant 0 : index
    %125 = tpu.strided_load %arg11[%c1_64, %c0_65] {strides = array<i32: 2, 1>} : memref<64x16xf32, #tpu.memory_space<vmem>>, vector<32x16xf32>
    %126 = arith.maximumf %124, %125 : vector<32x16xf32>
    %c0_66 = arith.constant 0 : index
    %c0_67 = arith.constant 0 : index
    %127 = tpu.strided_load %arg1[%c0_66, %c0_67] {strides = array<i32: 2, 1>} : memref<64x16xf32, #tpu.memory_space<vmem>>, vector<32x16xf32>
    %c1_68 = arith.constant 1 : index
    %c0_69 = arith.constant 0 : index
    %128 = tpu.strided_load %arg1[%c1_68, %c0_69] {strides = array<i32: 2, 1>} : memref<64x16xf32, #tpu.memory_space<vmem>>, vector<32x16xf32>
    %129 = arith.maximumf %127, %128 : vector<32x16xf32>
    %130 = arith.addf %126, %129 : vector<32x16xf32>
    %c0_70 = arith.constant 0 : index
    %c0_71 = arith.constant 0 : index
    %131 = vector.load %arg8[%c0_70, %c0_71] : memref<32x16xf32, #tpu.memory_space<vmem>>, vector<32x16xf32>
    tpu.vector_store %arg8[%c0_70, %c0_71], %130 {strides = array<i32>} : memref<32x16xf32, #tpu.memory_space<vmem>>, vector<32x16xf32>,
    return
  }
  func.func @transform_0(%arg0: i32) -> (i32, i32) {
    %c0_i32 = arith.constant 0 : i32
    %c0_i32_0 = arith.constant 0 : i32
    return %arg0, %c0_i32 : i32, i32
  }
  func.func @transform_1(%arg0: i32) -> (i32, i32) {
    %c0_i32 = arith.constant 0 : i32
    %c0_i32_0 = arith.constant 0 : i32
    %c0_i32_1 = arith.constant 0 : i32
    return %c0_i32, %c0_i32_0 : i32, i32
  }
  func.func @transform_2(%arg0: i32) -> (i32, i32) {
    %c0_i32 = arith.constant 0 : i32
    %c0_i32_0 = arith.constant 0 : i32
    %c0_i32_1 = arith.constant 0 : i32
    return %c0_i32, %c0_i32_0 : i32, i32
  }
  func.func @transform_3(%arg0: i32) -> (i32, i32) {
    %c0_i32 = arith.constant 0 : i32
    %c0_i32_0 = arith.constant 0 : i32
    %c0_i32_1 = arith.constant 0 : i32
    return %c0_i32, %c0_i32_0 : i32, i32
  }
  func.func @transform_4(%arg0: i32) -> (i32, i32) {
    %c0_i32 = arith.constant 0 : i32
    %c0_i32_0 = arith.constant 0 : i32
    %c0_i32_1 = arith.constant 0 : i32
    return %c0_i32, %c0_i32_0 : i32, i32
  }
  func.func @transform_5(%arg0: i32) -> (i32, i32) {
    %c0_i32 = arith.constant 0 : i32
    %c0_i32_0 = arith.constant 0 : i32
    %c0_i32_1 = arith.constant 0 : i32
    return %c0_i32, %c0_i32_0 : i32, i32
  }
  func.func @transform_6(%arg0: i32) -> (i32, i32) {
    %c0_i32 = arith.constant 0 : i32
    %c0_i32_0 = arith.constant 0 : i32
    %c0_i32_1 = arith.constant 0 : i32
    return %c0_i32, %c0_i32_0 : i32, i32
  }
  func.func @transform_7(%arg0: i32) -> (i32, i32) {
    %c0_i32 = arith.constant 0 : i32
    %c0_i32_0 = arith.constant 0 : i32
    return %arg0, %c0_i32 : i32, i32
  }
}

</mosaic_0001>

<bundles_post_ra>
// kernel: tpu_custom_call.1
= control target key start
LH: loop header
LB: loop body
LE: loop exit
PB: predicated region body
PF: predicated region fallthrough
CT: control target
= control target key end

     0   :  { %v105_v0 = vlaneseq  ;;  %vm210_vm0 = vcmask 130048   ;;  %s1010_s25 = smov 16   ;;  %vm387_vm5 = vcmask 261120   ;;  %vm424_vm6 = vcmask 392192   ;;  %s1260_s0 = inlined_call_operand.vmem [shape: f32[64,16], index: 0, kind: input, shape index: {}]   ;;  %s1261_s1 = inlined_call_operand.vmem [shape: f32[1,16], index: 1, kind: input, shape index: {}]   ;;  %s1262_s2 = inlined_call_operand.vmem [shape: f32[1,16], index: 2, kind: input, shape index: {}]   ;;  %s1263_s3 = inlined_call_operand.vmem [shape: bf16[48,16], index: 3, kind: input, shape index: {}]   ;;  %s1264_s4 = inlined_call_operand.vmem [shape: f32[1,16], index: 4, kind: input, shape index: {}]   ;;  %s1265_s5 = inlined_call_operand.vmem [shape: f32[1,16], index: 5, kind: input, shape index: {}]   ;;  %s1266_s6 = inlined_call_operand.vmem [shape: bf16[48,16], index: 6, kind: input, shape index: {}]   ;;  %s1267_s7 = inlined_call_operand.vmem [shape: f32[32,16], index: 7, kind: output, shape index: {}]  }
   0x1   :  { %v27_v1 = vld [vmem:[%s1260_s0] sm:$0xff]  ;;  %v28_v2 = vld [vmem:[%s1260_s0 + $0x8] sm:$0xff]  ;;  %v33_v3 = vld [vmem:[%s1260_s0 + $0x30] sm:$0xff] }
   0x2   :  { %v855_v4 = vld [vmem:[%s1261_s1] ss:$0 sm:$0xff]  ;;  %v29_v6 = vld [vmem:[%s1260_s0 + $0x10] sm:$0xff]  ;;  %v1070_v7 = vshrl.u32 %v105_v0, 7  ;;  %v30_v11 = vld [vmem:[%s1260_s0 + $0x18] sm:$0xff] }
   0x3   :  { %v856_v5 = vld [vmem:[%s1262_s2] ss:$0 sm:$0xff]  ;;  %v42_v8 = vmul.f32 %v855_v4, %v27_v1  ;;  %v43_v9 = vmul.f32 %v855_v4, %v28_v2  ;;  %v48_v10 = vmul.f32 %v855_v4, %v33_v3  ;;  %v44_v12 = vmul.f32 %v855_v4, %v29_v6  ;;  %v32_v14 = vld [vmem:[%s1260_s0 + $0x28] sm:$0xff]  ;;  %v34_v37 = vld [vmem:[%s1260_s0 + $0x38] sm:$0xff] }
   0x4   :  { %v31_v13 = vld [vmem:[%s1260_s0 + $0x20] sm:$0xff]  ;;  %v45_v15 = vmul.f32 %v855_v4, %v30_v11  ;;  %v47_v17 = vmul.f32 %v855_v4, %v32_v14  ;;  %v109_v25 = vadd.s32 24, %v1070_v7  ;;  %v49_v50 = vmul.f32 %v855_v4, %v34_v37  ;;  %v1005_v55 = vld [vmem:[%s1263_s3 + $0x8] sm:$0xff]  }
   0x5   :  { %v46_v16 = vmul.f32 %v855_v4, %v31_v13  ;;  %v57_v18 = vadd.f32 %v856_v5, %v42_v8  ;;  %v58_v19 = vadd.f32 %v856_v5, %v43_v9  ;;  %v63_v20 = vadd.f32 %v856_v5, %v48_v10  ;;  %v1004_v38 = vld [vmem:[%s1263_s3] sm:$0xff]  }
   0x6   :  { %v59_v21 = vadd.f32 %v856_v5, %v44_v12  ;;  %v60_v22 = vadd.f32 %v856_v5, %v45_v15  ;;  %v62_v24 = vadd.f32 %v856_v5, %v47_v17  ;;  %v139_v42 = vand.u32 31, %v109_v25  ;;  %894 = vmatprep.subr.bf16.mxu0 %v1004_v38 }
   0x7   :  { %v61_v23 = vadd.f32 %v856_v5, %v46_v16  ;;  %v65_v26 = vadd.f32 3.0, %v57_v18  ;;  %v66_v27 = vadd.f32 3.0, %v58_v19  ;;  %v71_v28 = vadd.f32 3.0, %v63_v20  ;;  %895 = vmatpush3.bf16.msra.mxu0 %v1004_v38 }
   0x8   :  { %v67_v29 = vadd.f32 3.0, %v59_v21  ;;  %v68_v30 = vadd.f32 3.0, %v60_v22  ;;  %v70_v32 = vadd.f32 3.0, %v62_v24  ;;  %v64_v59 = vadd.f32 %v856_v5, %v49_v50  ;;  %896 = vmatprep.subr.bf16.mxu0 %v1005_v55  ;;  %v1006_v5 = vld [vmem:[%s1263_s3 + $0x10] sm:$0xff]   ;;  %s1011_s3 = smov 32  }
   0x9   :  { %v69_v31 = vadd.f32 3.0, %v61_v23  ;;  %v73_v33 = vmax.f32 %v65_v26, 0.0  ;;  %v74_v34 = vmax.f32 %v66_v27, 0.0  ;;  %v79_v35 = vmax.f32 %v71_v28, 0.0 }
   0xa   :  { %v75_v36 = vmax.f32 %v67_v29, 0.0  ;;  %v76_v39 = vmax.f32 %v68_v30, 0.0  ;;  %v78_v41 = vmax.f32 %v70_v32, 0.0  ;;  %v72_v4 = vadd.f32 3.0, %v64_v59 }
   0xb   :  { %v77_v40 = vmax.f32 %v69_v31, 0.0  ;;  %v81_v43 = vmin.f32 %v73_v33, 6.0  ;;  %v82_v44 = vmin.f32 %v74_v34, 6.0  ;;  %v87_v45 = vmin.f32 %v79_v35, 6.0  ;;  %897 = vmatpush3.bf16.msra.mxu0 %v1005_v55 }
   0xc   :  { %v83_v46 = vmin.f32 %v75_v36, 6.0  ;;  %v84_v47 = vmin.f32 %v76_v39, 6.0  ;;  %v86_v49 = vmin.f32 %v78_v41, 6.0  ;;  %v1101_v8 = vadd.s32 1, %v139_v42  ;;  %898 = vmatprep.subr.bf16.mxu0 %v1006_v5 }
   0xd   :  { %v85_v48 = vmin.f32 %v77_v40, 6.0  ;;  %v89_v51 = vmul.f32 %v81_v43, %v57_v18  ;;  %v90_v52 = vmul.f32 %v82_v44, %v58_v19  ;;  %v95_v54 = vmul.f32 %v87_v45, %v63_v20 }
   0xe   :  { %v91_v53 = vmul.f32 %v83_v46, %v59_v21  ;;  %v92_v56 = vmul.f32 %v84_v47, %v60_v22  ;;  %v94_v58 = vmul.f32 %v86_v49, %v62_v24  ;;  %v80_v9 = vmax.f32 %v72_v4, 0.0 }
   0xf   :  { %v93_v57 = vmul.f32 %v85_v48, %v61_v23  ;;  %v97_v60 = vmul.f32 0.16666667, %v89_v51  ;;  %v98_v61 = vmul.f32 0.16666667, %v90_v52  ;;  %v103_v3 = vmul.f32 0.16666667, %v95_v54  ;;  %899 = vmatpush3.bf16.msra.mxu0 %v1006_v5 }
  0x10   :  { %v99_v62 = vmul.f32 0.16666667, %v91_v53  ;;  %v100_v63 = vmul.f32 0.16666667, %v92_v56  ;;  %v102_v1 = vmul.f32 0.16666667, %v94_v58 }
  0x11   :  { %v101_v0 = vmul.f32 0.16666667, %v93_v57  ;;  %212 = vst.msk [vmem:[#allocation2 + $0x9] sm:$0xff] %vm210_vm0, %v98_v61  ;;  %v924_v2 = vpack.i.bf16 %v98_v61, %v97_v60  ;;  %211 = vst.msk [vmem:[#allocation2 + $0x1] sm:$0xff] %vm210_vm0, %v97_v60  ;;  %v113_v10 = vadd.s32 56, %v1070_v7  ;;  %v88_v11 = vmin.f32 %v80_v9, 6.0 }
  0x12   :  { %213 = vst.msk [vmem:[#allocation2 + $0x11] sm:$0xff] %vm210_vm0, %v99_v62  ;;  %214 = vst.msk [vmem:[#allocation2 + $0x19] sm:$0xff] %vm210_vm0, %v100_v63  ;;  %v929_v6 = vpack.i.bf16 %v100_v63, %v99_v62  ;;  %vm294_vm1 = vcmp.lt.s32.totalorder %v1101_v8, 32  ;;  %v110_v32 = vadd.s32 32, %v1070_v7  ;;  %v118_v33 = vand.u32 31, %v1070_v7 }
  0x13   :  { %216 = vst.msk [vmem:[#allocation2 + $0x29] sm:$0xff] %vm210_vm0, %v102_v1  ;;  %215 = vst.msk [vmem:[#allocation2 + $0x21] sm:$0xff] %vm210_vm0, %v101_v0  ;;  %925 = vrot.lane.b32.xlu0 %v924_v2, %s1010_s25  ;;  %v934_v12 = vpack.i.bf16 %v102_v1, %v101_v0  ;;  %v96_v13 = vmul.f32 %v88_v11, %v64_v59  ;;  %v167_v16 = vand.u32 31, %v113_v10 }
  0x14   :  { %217 = vst.msk [vmem:[#allocation2 + $0x31] sm:$0xff] %vm210_vm0, %v103_v3  ;;  %v146_v34 = vand.u32 31, %v110_v32  ;;  %v1123_v35 = vadd.s32 4294967295, %v118_v33 }
  0x15   :  { %v104_v21 = vmul.f32 0.16666667, %v96_v13  ;;  %v1112_v26 = vadd.s32 1, %v167_v16 }
  0x16   :  { %v1125_v37 = vadd.s32 4294967295, %v146_v34  ;;  %vm235_vm3 = vcmp.ge.s32.totalorder %v1123_v35, 0 }
  0x17   :  { %930 = vrot.lane.b32.xlu0 %v929_v6, %s1010_s25  ;;  %218 = vst.msk [vmem:[#allocation2 + $0x39] sm:$0xff] %vm210_vm0, %v104_v21  ;;  %v949_v27 = vpack.i.bf16 %v104_v21, %v103_v3  ;;  %vm298_vm2 = vcmp.lt.s32.totalorder %v1112_v26, 32 }
  0x18   :  { %v267_v14 = vld [vmem:[#allocation2 + $0x2] sm:$0xff]  ;;  %vm239_vm4 = vcmp.ge.s32.totalorder %v1125_v37, 0 }
  0x19   :  { %v268_v15 = vld [vmem:[#allocation2 + $0xa] sm:$0xff]  ;;  %v269_v18 = vld [vmem:[#allocation2 + $0x12] sm:$0xff]  ;;  %v219_v38 = vld [vmem:[#allocation2] sm:$0xff] }
  0x1a   :  { %v939_v17 = vpack.i.bf16 %v268_v15, %v267_v14  ;;  %v270_v19 = vld [vmem:[#allocation2 + $0x1a] sm:$0xff]  ;;  %v271_v20 = vld [vmem:[#allocation2 + $0x22] sm:$0xff]  ;;  %v259_v44 = vsel %vm235_vm3, %v219_v38, 0.0  ;;  %v221_v52 = vld [vmem:[#allocation2 + $0x10] sm:$0xff] }
  0x1b   :  { %v310_v22 = vsel %vm294_vm1, %v270_v19, 0.0  ;;  %v272_v23 = vld [vmem:[#allocation2 + $0x2a] sm:$0xff]  ;;  %935 = vrot.lane.b32.xlu0 %v934_v12, %s1010_s25  ;;  %v223_v42 = vld [vmem:[#allocation2 + $0x20] sm:$0xff]  ;;  %v222_v45 = vld [vmem:[#allocation2 + $0x18] sm:$0xff] }
  0x1c   :  { %940 = vrot.lane.b32.xlu1 %v939_v17, %s1011_s3  ;;  %v944_v24 = vpack.i.bf16 %v310_v22, %v269_v18  ;;  %v954_v25 = vpack.i.bf16 %v272_v23, %v271_v20  ;;  %v220_v43 = vld [vmem:[#allocation2 + $0x8] sm:$0xff]  ;;  %v263_v48 = vsel %vm239_vm4, %v223_v42, 0.0  ;;  %v225_v18 = vld [vmem:[#allocation2 + $0x30] sm:$0xff] }
  0x1d   :  { %v224_v55 = vld [vmem:[#allocation2 + $0x28] sm:$0xff] }
  0x1e   :  { %v273_v28 = vld [vmem:[#allocation2 + $0x32] sm:$0xff]  ;;  %v274_v29 = vld [vmem:[#allocation2 + $0x3a] sm:$0xff] }
  0x1f   :  { %955 = vrot.lane.b32.xlu0 %v954_v25, %s1011_s3  ;;  %v314_v30 = vsel %vm298_vm2, %v274_v29, 0.0  ;;  %v226_v19 = vld [vmem:[#allocation2 + $0x38] sm:$0xff]  ;;  %v864_v29 = vld [vmem:[%s1264_s4] ss:$0 sm:$0xff] }
  0x20   :  { %945 = vrot.lane.b32.xlu1 %v944_v24, %s1011_s3  ;;  %v959_v31 = vpack.i.bf16 %v314_v30, %v273_v28 }
  0x24   :  { %950 = vrot.lane.b32.xlu1 %v949_v27, %s1010_s25 }
  0x28   :  { %960 = vrot.lane.b32.xlu1 %v959_v31, %s1011_s3  ;;  %v865_v31 = vld [vmem:[%s1265_s5] ss:$0 sm:$0xff] }
  0x85   :  { %v926_v36 = vpop.permute.xlu0 %925 }
  0x86   :  { %v928_v39 = vunpack.i.h.bf16 %v926_v36  ;;  %v927_v40 = vunpack.i.l.bf16 %v926_v36 }
  0x88   :  { %v379_v50 = vsel %vm210_vm0, %v259_v44, %v927_v40  ;;  %v380_v51 = vsel %vm210_vm0, %v220_v43, %v928_v39 }
  0x89   :  { %v931_v41 = vpop.permute.xlu0 %930 }
  0x8a   :  { %v933_v7 = vunpack.i.h.bf16 %v931_v41  ;;  %v932_v46 = vunpack.i.l.bf16 %v931_v41 }
  0x8c   :  { %v382_v58 = vsel %vm210_vm0, %v222_v45, %v933_v7  ;;  %v381_v61 = vsel %vm210_vm0, %v221_v52, %v932_v46 }
  0x8d   :  { %v936_v49 = vpop.permute.xlu0 %935 }
  0x8e   :  { %v941_v47 = vpop.permute.xlu1 %940  ;;  %v938_v56 = vunpack.i.h.bf16 %v936_v49  ;;  %v937_v57 = vunpack.i.l.bf16 %v936_v49 }
  0x8f   :  { %v943_v53 = vunpack.i.h.bf16 %v941_v47  ;;  %v942_v54 = vunpack.i.l.bf16 %v941_v47 }
  0x90   :  { %v384_v62 = vsel %vm210_vm0, %v224_v55, %v938_v56  ;;  %v383_v63 = vsel %vm210_vm0, %v263_v48, %v937_v57 }
  0x91   :  { %v388_v59 = vsel %vm387_vm5, %v379_v50, %v942_v54  ;;  %v389_v60 = vsel %vm387_vm5, %v380_v51, %v943_v53  ;;  %v956_v2 = vpop.permute.xlu0 %955 }
  0x92   :  { %v946_v0 = vpop.permute.xlu1 %945  ;;  %v396_v1 = vpack.c.bf16 %v389_v60, %v388_v59  ;;  %v958_v5 = vunpack.i.h.bf16 %v956_v2  ;;  %v957_v6 = vunpack.i.l.bf16 %v956_v2 }
  0x93   :  { %v948_v3 = vunpack.i.h.bf16 %v946_v0  ;;  %v947_v4 = vunpack.i.l.bf16 %v946_v0 }
  0x94   :  { %900 = vmatprep.mubr.msk.bf16.mxu0 %vm424_vm6, %v396_v1  ;;  %v392_v11 = vsel %vm387_vm5, %v383_v63, %v957_v6  ;;  %v393_v12 = vsel %vm387_vm5, %v384_v62, %v958_v5 }
  0x95   :  { %v391_v9 = vsel %vm387_vm5, %v382_v58, %v948_v3  ;;  %v390_v10 = vsel %vm387_vm5, %v381_v61, %v947_v4  ;;  %v398_v14 = vpack.c.bf16 %v393_v12, %v392_v11 }
  0x96   :  { %v397_v13 = vpack.c.bf16 %v391_v9, %v390_v10  ;;  %v951_v15 = vpop.permute.xlu1 %950  ;;  %v1007_v10 = vld [vmem:[%s1266_s6] sm:$0xff]  }
  0x97   :  { %v953_v16 = vunpack.i.h.bf16 %v951_v15  ;;  %v952_v17 = vunpack.i.l.bf16 %v951_v15  ;;  %908 = vmatprep.subr.bf16.mxu1 %v1007_v10 }
  0x98   :  { %901 = vmatmul.mubr.msk.bf16.vlgmr.msra.gmra.mrb[0].mxu0 %vm424_vm6, %v397_v13  ;;  %909 = vmatpush3.bf16.msra.mxu1 %v1007_v10 }
  0x99   :  { %904 = vmatprep.mubr.msk.bf16.mxu0 %vm424_vm6, %v398_v14  ;;  %v386_v23 = vsel %vm210_vm0, %v226_v19, %v953_v16  ;;  %v385_v24 = vsel %vm210_vm0, %v225_v18, %v952_v17 }
  0x9a   :  { %v961_v20 = vpop.permute.xlu1 %960 }
  0x9b   :  { %v963_v21 = vunpack.i.h.bf16 %v961_v20  ;;  %v962_v22 = vunpack.i.l.bf16 %v961_v20 }
  0x9d   :  { %v394_v25 = vsel %vm387_vm5, %v385_v24, %v962_v22  ;;  %v395_v27 = vsel %vm387_vm5, %v386_v23, %v963_v21  ;;  %v1008_v24 = vld [vmem:[%s1266_s6 + $0x8] sm:$0xff]  }
  0x9e   :  { %v399_v28 = vpack.c.bf16 %v395_v27, %v394_v25  ;;  %910 = vmatprep.subr.bf16.mxu1 %v1008_v24 }
  0x9f   :  { %911 = vmatpush3.bf16.msra.mxu1 %v1008_v24 }
  0xa0   :  { %905 = vmatmul.mubr.msk.bf16.gmra.mrb[4].mxu0 %vm424_vm6, %v399_v28 }
 0x16b   :  { %v902_v30 = vpop.f32.mrb[0].mxu0 }
 0x16c   :  { %v511_v32 = vmul.f32 %v902_v30, %v864_v29  ;;  %v471_v33 = vpop.f32.mrb[1].mxu0 }
 0x16d   :  { %v509_v34 = vmul.f32 %v864_v29, %v471_v33  ;;  %v903_v36 = vpop.f32.mrb[2].mxu0 }
 0x16e   :  { %v526_v38 = vadd.f32 %v865_v31, %v511_v32  ;;  %v512_v39 = vmul.f32 %v903_v36, %v864_v29  ;;  %v474_v40 = vpop.f32.mrb[3].mxu0 }
 0x16f   :  { %v524_v41 = vadd.f32 %v865_v31, %v509_v34  ;;  %v510_v42 = vmul.f32 %v864_v29, %v474_v40 }
 0x170   :  { %v534_v43 = vadd.f32 3.0, %v526_v38  ;;  %v527_v44 = vadd.f32 %v865_v31, %v512_v39  ;;  %v1009_v39 = vld [vmem:[%s1266_s6 + $0x10] sm:$0xff]  }
 0x171   :  { %v532_v7 = vadd.f32 3.0, %v524_v41  ;;  %v525_v45 = vadd.f32 %v865_v31, %v510_v42  ;;  %912 = vmatprep.subr.bf16.mxu1 %v1009_v39 }
 0x172   :  { %v542_v46 = vmax.f32 %v534_v43, 0.0  ;;  %v535_v47 = vadd.f32 3.0, %v527_v44  ;;  %913 = vmatpush3.bf16.msra.mxu1 %v1009_v39 }
 0x173   :  { %v540_v48 = vmax.f32 %v532_v7, 0.0  ;;  %v533_v49 = vadd.f32 3.0, %v525_v45  ;;  %v906_v50 = vpop.f32.mrb[4].mxu0 }
 0x174   :  { %v550_v51 = vmin.f32 %v542_v46, 6.0  ;;  %v543_v52 = vmax.f32 %v535_v47, 0.0  ;;  %v515_v53 = vmul.f32 %v906_v50, %v864_v29  ;;  %v487_v54 = vpop.f32.mrb[5].mxu0 }
 0x175   :  { %v548_v55 = vmin.f32 %v540_v48, 6.0  ;;  %v541_v56 = vmax.f32 %v533_v49, 0.0  ;;  %v513_v57 = vmul.f32 %v864_v29, %v487_v54  ;;  %v907_v58 = vpop.f32.mrb[6].mxu0 }
 0x176   :  { %v558_v59 = vmul.f32 %v550_v51, %v526_v38  ;;  %v551_v60 = vmin.f32 %v543_v52, 6.0  ;;  %v530_v61 = vadd.f32 %v865_v31, %v515_v53  ;;  %v516_v62 = vmul.f32 %v907_v58, %v864_v29  ;;  %v490_v63 = vpop.f32.mrb[7].mxu0 }
 0x177   :  { %v556_v0 = vmul.f32 %v548_v55, %v524_v41  ;;  %v549_v1 = vmin.f32 %v541_v56, 6.0  ;;  %v528_v2 = vadd.f32 %v865_v31, %v513_v57  ;;  %v514_v3 = vmul.f32 %v864_v29, %v490_v63 }
 0x178   :  { %v566_v4 = vmul.f32 0.16666667, %v558_v59  ;;  %v559_v5 = vmul.f32 %v551_v60, %v527_v44  ;;  %v538_v6 = vadd.f32 3.0, %v530_v61  ;;  %v531_v9 = vadd.f32 %v865_v31, %v516_v62 }
 0x179   :  { %v564_v11 = vmul.f32 0.16666667, %v556_v0  ;;  %v557_v12 = vmul.f32 %v549_v1, %v525_v45  ;;  %v536_v13 = vadd.f32 3.0, %v528_v2  ;;  %v529_v14 = vadd.f32 %v865_v31, %v514_v3 }
 0x17a   :  { %574 = vst.msk [vmem:[#allocation3 + $0x11] sm:$0xff] %vm210_vm0, %v566_v4  ;;  %v567_v15 = vmul.f32 0.16666667, %v559_v5  ;;  %v546_v16 = vmax.f32 %v538_v6, 0.0  ;;  %v539_v17 = vadd.f32 3.0, %v531_v9 }
 0x17b   :  { %572 = vst.msk [vmem:[#allocation3 + $0x1] sm:$0xff] %vm210_vm0, %v564_v11  ;;  %v565_v18 = vmul.f32 0.16666667, %v557_v12  ;;  %v544_v19 = vmax.f32 %v536_v13, 0.0  ;;  %v537_v20 = vadd.f32 3.0, %v529_v14 }
 0x17c   :  { %575 = vst.msk [vmem:[#allocation3 + $0x19] sm:$0xff] %vm210_vm0, %v567_v15  ;;  %v554_v21 = vmin.f32 %v546_v16, 6.0  ;;  %v547_v22 = vmax.f32 %v539_v17, 0.0  ;;  %v964_v23 = vpack.i.bf16 %v567_v15, %v566_v4 }
 0x17d   :  { %573 = vst.msk [vmem:[#allocation3 + $0x9] sm:$0xff] %vm210_vm0, %v565_v18  ;;  %v552_v25 = vmin.f32 %v544_v19, 6.0  ;;  %v545_v27 = vmax.f32 %v537_v20, 0.0  ;;  %v969_v28 = vpack.i.bf16 %v565_v18, %v564_v11 }
 0x17e   :  { %v562_v29 = vmul.f32 %v554_v21, %v530_v61  ;;  %v555_v30 = vmin.f32 %v547_v22, 6.0  ;;  %965 = vrot.lane.b32.xlu1 %v964_v23, %s1010_s25 }
 0x17f   :  { %v560_v31 = vmul.f32 %v552_v25, %v528_v2  ;;  %v553_v32 = vmin.f32 %v545_v27, 6.0  ;;  %970 = vrot.lane.b32.xlu0 %v969_v28, %s1010_s25 }
 0x180   :  { %v570_v33 = vmul.f32 0.16666667, %v562_v29  ;;  %v563_v34 = vmul.f32 %v555_v30, %v531_v9 }
 0x181   :  { %v568_v36 = vmul.f32 0.16666667, %v560_v31  ;;  %v561_v38 = vmul.f32 %v553_v32, %v529_v14 }
 0x182   :  { %578 = vst.msk [vmem:[#allocation3 + $0x31] sm:$0xff] %vm210_vm0, %v570_v33  ;;  %v571_v40 = vmul.f32 0.16666667, %v563_v34  ;;  %v580_v59 = vld [vmem:[#allocation3] sm:$0xff] }
 0x183   :  { %576 = vst.msk [vmem:[#allocation3 + $0x21] sm:$0xff] %vm210_vm0, %v568_v36  ;;  %v569_v41 = vmul.f32 0.16666667, %v561_v38  ;;  %v598_v47 = vld [vmem:[#allocation3 + $0x12] sm:$0xff]  ;;  %v588_v0 = vsel %vm235_vm3, %v580_v59, 0.0 }
 0x184   :  { %579 = vst.msk [vmem:[#allocation3 + $0x39] sm:$0xff] %vm210_vm0, %v571_v40  ;;  %v596_v42 = vld [vmem:[#allocation3 + $0x2] sm:$0xff]  ;;  %v597_v43 = vld [vmem:[#allocation3 + $0xa] sm:$0xff]  ;;  %v989_v44 = vpack.i.bf16 %v571_v40, %v570_v33  ;;  %v583_v15 = vld [vmem:[#allocation3 + $0x18] sm:$0xff] }
 0x185   :  { %577 = vst.msk [vmem:[#allocation3 + $0x29] sm:$0xff] %vm210_vm0, %v569_v41  ;;  %v974_v7 = vpack.i.bf16 %v597_v43, %v596_v42  ;;  %v979_v45 = vpack.i.bf16 %v569_v41, %v568_v36  ;;  %v581_v63 = vld [vmem:[#allocation3 + $0x8] sm:$0xff]  ;;  %v582_v14 = vld [vmem:[#allocation3 + $0x10] sm:$0xff] }
 0x187   :  { %975 = vrot.lane.b32.xlu0 %v974_v7, %s1011_s3 }
 0x18a   :  { %v599_v46 = vld [vmem:[#allocation3 + $0x1a] sm:$0xff] }
 0x18b   :  { %980 = vrot.lane.b32.xlu0 %v979_v45, %s1010_s25  ;;  %v607_v48 = vsel %vm294_vm1, %v599_v46, 0.0  ;;  %v603_v53 = vld [vmem:[#allocation3 + $0x3a] sm:$0xff]  ;;  %v602_v54 = vld [vmem:[#allocation3 + $0x32] sm:$0xff] }
 0x18c   :  { %v984_v49 = vpack.i.bf16 %v607_v48, %v598_v47  ;;  %v600_v50 = vld [vmem:[#allocation3 + $0x22] sm:$0xff]  ;;  %v601_v51 = vld [vmem:[#allocation3 + $0x2a] sm:$0xff]  ;;  %v611_v55 = vsel %vm298_vm2, %v603_v53, 0.0  ;;  %v587_v40 = vld [vmem:[#allocation3 + $0x38] sm:$0xff] }
 0x18d   :  { %v994_v52 = vpack.i.bf16 %v601_v51, %v600_v50  ;;  %v999_v56 = vpack.i.bf16 %v611_v55, %v602_v54  ;;  %v584_v11 = vld [vmem:[#allocation3 + $0x20] sm:$0xff]  ;;  %v585_v22 = vld [vmem:[#allocation3 + $0x28] sm:$0xff]  ;;  %v586_v39 = vld [vmem:[#allocation3 + $0x30] sm:$0xff] }
 0x18e   :  { %985 = vrot.lane.b32.xlu1 %v984_v49, %s1011_s3  ;;  %v592_v16 = vsel %vm239_vm4, %v584_v11, 0.0  ;;  %v873_v51 = vld [vmem:[%s1260_s0 + $0x10] ss:$2 sm:$0xff]  ;;  %v824_v53 = vld [vmem:[%s1260_s0] ss:$2 sm:$0xff] }
 0x18f   :  { %995 = vrot.lane.b32.xlu0 %v994_v52, %s1011_s3  ;;  %v877_v52 = vld [vmem:[%s1260_s0 + $0x11] ss:$2 sm:$0xff]  ;;  %v876_v54 = vld [vmem:[%s1260_s0 + $0x1] ss:$2 sm:$0xff] }
 0x190   :  { %v839_v59 = vmax.f32 %v824_v53, %v876_v54 }
 0x192   :  { %990 = vrot.lane.b32.xlu1 %v989_v44, %s1010_s25 }
 0x196   :  { %1000 = vrot.lane.b32.xlu1 %v999_v56, %s1011_s3  ;;  %v840_v56 = vmax.f32 %v873_v51, %v877_v52 }
 0x1f0   :  { %v966_v1 = vpop.permute.xlu1 %965 }
 0x1f1   :  { %v971_v8 = vpop.permute.xlu0 %970  ;;  %v968_v9 = vunpack.i.h.bf16 %v966_v1  ;;  %v967_v10 = vunpack.i.l.bf16 %v966_v1 }
 0x1f2   :  { %v973_v57 = vunpack.i.h.bf16 %v971_v8  ;;  %v972_v58 = vunpack.i.l.bf16 %v971_v8 }
 0x1f3   :  { %v678_v20 = vsel %vm210_vm0, %v582_v14, %v967_v10  ;;  %v679_v21 = vsel %vm210_vm0, %v583_v15, %v968_v9 }
 0x1f4   :  { %v676_v26 = vsel %vm210_vm0, %v588_v0, %v972_v58  ;;  %v677_v2 = vsel %vm210_vm0, %v581_v63, %v973_v57 }
 0x1f9   :  { %v976_v60 = vpop.permute.xlu0 %975 }
 0x1fa   :  { %v978_v61 = vunpack.i.h.bf16 %v976_v60  ;;  %v977_v62 = vunpack.i.l.bf16 %v976_v60 }
 0x1fc   :  { %v684_v3 = vsel %vm387_vm5, %v676_v26, %v977_v62  ;;  %v685_v4 = vsel %vm387_vm5, %v677_v2, %v978_v61 }
 0x1fd   :  { %v981_v5 = vpop.permute.xlu0 %980  ;;  %v692_v6 = vpack.c.bf16 %v685_v4, %v684_v3  ;;  %v875_v3 = vld [vmem:[%s1260_s0 + $0x30] ss:$2 sm:$0xff]  ;;  %v879_v4 = vld [vmem:[%s1260_s0 + $0x31] ss:$2 sm:$0xff] }
 0x1fe   :  { %v983_v12 = vunpack.i.h.bf16 %v981_v5  ;;  %v982_v13 = vunpack.i.l.bf16 %v981_v5  ;;  %v874_v5 = vld [vmem:[%s1260_s0 + $0x20] ss:$2 sm:$0xff]  ;;  %v842_v9 = vmax.f32 %v875_v3, %v879_v4 }
 0x1ff   :  { %914 = vmatprep.mubr.msk.bf16.mxu1 %vm424_vm6, %v692_v6  ;;  %v878_v6 = vld [vmem:[%s1260_s0 + $0x21] ss:$2 sm:$0xff] }
 0x200   :  { %v986_v35 = vpop.permute.xlu1 %985  ;;  %v680_v25 = vsel %vm210_vm0, %v592_v16, %v982_v13  ;;  %v681_v27 = vsel %vm210_vm0, %v585_v22, %v983_v12  ;;  %v841_v12 = vmax.f32 %v874_v5, %v878_v6 }
 0x201   :  { %v988_v17 = vunpack.i.h.bf16 %v986_v35  ;;  %v987_v18 = vunpack.i.l.bf16 %v986_v35  ;;  %v996_v19 = vpop.permute.xlu0 %995 }
 0x202   :  { %v998_v23 = vunpack.i.h.bf16 %v996_v19  ;;  %v997_v24 = vunpack.i.l.bf16 %v996_v19 }
 0x203   :  { %v687_v28 = vsel %vm387_vm5, %v679_v21, %v988_v17  ;;  %v686_v29 = vsel %vm387_vm5, %v678_v20, %v987_v18 }
 0x204   :  { %v693_v37 = vpack.c.bf16 %v687_v28, %v686_v29  ;;  %v688_v30 = vsel %vm387_vm5, %v680_v25, %v997_v24  ;;  %v689_v31 = vsel %vm387_vm5, %v681_v27, %v998_v23  ;;  %v991_v32 = vpop.permute.xlu1 %990 }
 0x205   :  { %v694_v33 = vpack.c.bf16 %v689_v31, %v688_v30  ;;  %v993_v34 = vunpack.i.h.bf16 %v991_v32  ;;  %v992_v36 = vunpack.i.l.bf16 %v991_v32 }
 0x206   :  { %915 = vmatmul.mubr.msk.bf16.vlgmr.msra.gmra.mrb[0].mxu1 %vm424_vm6, %v693_v37 }
 0x207   :  { %918 = vmatprep.mubr.msk.bf16.mxu1 %vm424_vm6, %v694_v33  ;;  %v682_v43 = vsel %vm210_vm0, %v586_v39, %v992_v36  ;;  %v683_v44 = vsel %vm210_vm0, %v587_v40, %v993_v34 }
 0x208   :  { %v1001_v38 = vpop.permute.xlu1 %1000 }
 0x209   :  { %v1003_v41 = vunpack.i.h.bf16 %v1001_v38  ;;  %v1002_v42 = vunpack.i.l.bf16 %v1001_v38 }
 0x20b   :  { %v690_v7 = vsel %vm387_vm5, %v682_v43, %v1002_v42  ;;  %v691_v45 = vsel %vm387_vm5, %v683_v44, %v1003_v41 }
 0x20c   :  { %v695_v46 = vpack.c.bf16 %v691_v45, %v690_v7 }
 0x20e   :  { %919 = vmatmul.mubr.msk.bf16.gmra.mrb[4].mxu1 %vm424_vm6, %v695_v46 }
 0x2d9   :  { %v916_v47 = vpop.f32.mrb[0].mxu1 }
 0x2da   :  { %799 = vst.msk [vmem:[#allocation4 + $0x10] sm:$0xff] %vm210_vm0, %v916_v47  ;;  %v766_v48 = vpop.f32.mrb[1].mxu1 }
 0x2db   :  { %797 = vst.msk [vmem:[#allocation4] sm:$0xff] %vm210_vm0, %v766_v48  ;;  %v917_v49 = vpop.f32.mrb[2].mxu1 }
 0x2dc   :  { %800 = vst.msk [vmem:[#allocation4 + $0x18] sm:$0xff] %vm210_vm0, %v917_v49  ;;  %v769_v50 = vpop.f32.mrb[3].mxu1 }
 0x2dd   :  { %798 = vst.msk [vmem:[#allocation4 + $0x8] sm:$0xff] %vm210_vm0, %v769_v50 }
 0x2e1   :  { %v920_v55 = vpop.f32.mrb[4].mxu1 }
 0x2e2   :  { %803 = vst.msk [vmem:[#allocation4 + $0x30] sm:$0xff] %vm210_vm0, %v920_v55  ;;  %v782_v8 = vpop.f32.mrb[5].mxu1 }
 0x2e3   :  { %v807_v57 = vld [vmem:[#allocation4 + $0x10] ss:$2 sm:$0xff]  ;;  %v815_v58 = vld [vmem:[#allocation4 + $0x11] ss:$2 sm:$0xff]  ;;  %801 = vst.msk [vmem:[#allocation4 + $0x20] sm:$0xff] %vm210_vm0, %v782_v8  ;;  %v921_v60 = vpop.f32.mrb[6].mxu1 }
 0x2e4   :  { %v821_v61 = vmax.f32 %v807_v57, %v815_v58  ;;  %v805_v62 = vld [vmem:[#allocation4] ss:$2 sm:$0xff]  ;;  %v813_v63 = vld [vmem:[#allocation4 + $0x1] ss:$2 sm:$0xff]  ;;  %804 = vst.msk [vmem:[#allocation4 + $0x38] sm:$0xff] %vm210_vm0, %v921_v60  ;;  %v785_v0 = vpop.f32.mrb[7].mxu1 }
 0x2e5   :  { %v820_v1 = vmax.f32 %v805_v62, %v813_v63  ;;  %802 = vst.msk [vmem:[#allocation4 + $0x28] sm:$0xff] %vm210_vm0, %v785_v0 }
 0x2e6   :  { %v844_v26 = vadd.f32 %v840_v56, %v821_v61 }
 0x2e7   :  { %v843_v2 = vadd.f32 %v839_v59, %v820_v1 }
 0x2e8   :  { %848 = vst.msk [vmem:[%s1267_s7 + $0x8] sm:$0xff] %vm210_vm0, %v844_v26 }
 0x2e9   :  { %847 = vst.msk [vmem:[%s1267_s7] sm:$0xff] %vm210_vm0, %v843_v2 }
 0x2eb   :  { %v811_v10 = vld [vmem:[#allocation4 + $0x30] ss:$2 sm:$0xff]  ;;  %v819_v11 = vld [vmem:[#allocation4 + $0x31] ss:$2 sm:$0xff] }
 0x2ec   :  { %v823_v13 = vmax.f32 %v811_v10, %v819_v11  ;;  %v809_v35 = vld [vmem:[#allocation4 + $0x20] ss:$2 sm:$0xff]  ;;  %v817_v14 = vld [vmem:[#allocation4 + $0x21] ss:$2 sm:$0xff] }
 0x2ed   :  { %v822_v15 = vmax.f32 %v809_v35, %v817_v14 }
 0x2ee   :  { %v846_v16 = vadd.f32 %v842_v9, %v823_v13 }
 0x2ef   :  { %v845_v17 = vadd.f32 %v841_v12, %v822_v15 }
 0x2f0   :  { %850 = vst.msk [vmem:[%s1267_s7 + $0x18] sm:$0xff] %vm210_vm0, %v846_v16 }
 0x2f1   :  { %849 = vst.msk [vmem:[%s1267_s7 + $0x10] sm:$0xff] %vm210_vm0, %v845_v17 }

</bundles_post_ra>
